<compile_context>
chip_gen: v5e
topology: v5e:2x2
jax: 0.10.0
libtpu: 0.0.40
codegen_flags: <defaults>
</compile_context>

<pallas_src>
import math

import jax
import jax.numpy as jnp
from jax.experimental import pallas as pl
from jax.experimental.pallas import tpu as pltpu

_LANES = 128


def _device_num_parts():
    """2 only on multi-TensorCore chips (v7x); 1 on single-TC v5e/v6e."""
    try:
        kind = jax.devices()[0].device_kind.lower()
    except Exception:
        return 1
    return 2 if ("v7" in kind or "7x" in kind) else 1


def _vmem_caps():
    """(vmem capacity, resident-set budget) in bytes, per core."""
    try:
        cap = int(pltpu.get_tpu_info().vmem_capacity_bytes)
    except Exception:
        cap = 64 << 20                       # conservative (v7x-class) fallback
    # v7x: 64 MiB/TC -> keep ~20 MiB resident; v5e/v6e (128 MiB) -> ~40 MiB.
    budget = (20 << 20) if cap <= (64 << 20) else (40 << 20)
    return cap, budget


def _choose_row_tile(B, C, rows, x_isize, t_isize, budget, num_parts):
    """Rows per tile: either the full row extent (small inputs, always a legal
    block) or a multiple of 32 sized so double-buffered x/t tiles + the tiny
    accumulators fit the budget and the x block sits near the ~4 MiB
    bandwidth sweet spot."""
    acc_bytes = 3 * B * C * 8 * _LANES * 4
    per_row = _LANES * 2 * (B * C * x_isize + B * t_isize)   # 2x-buffered x & t
    ts_budget = (budget - acc_bytes - (2 << 20)) // max(1, per_row)
    ts_xblk = (4 << 20) // max(1, B * C * _LANES * x_isize)  # ~4 MiB x block
    rows_per_part = -(-rows // num_parts)                    # balance across TCs
    ts = min(ts_budget, ts_xblk, -(-rows_per_part // 32) * 32)
    ts = max(32, (ts // 32) * 32)
    if ts >= rows:
        return int(rows)        # single full-extent block (block == array dim)
    return int(ts)


def _make_dice_sums_kernel(B, C, ts, rows, steps_per_part, ragged, acc_rows):
    """Per-(batch, class) intersect / pred-area / target-area partial sums."""
    fold_groups = ts // 8 if ts % 8 == 0 else 0   # 0 => acc_rows == ts (tiny case)

    def kernel(x_ref, t_ref, inter_ref, iarea_ref, tarea_ref,
               inter_acc, iarea_acc, tarea_acc):
        j = pl.program_id(1)

        @pl.when(j == 0)
        def _():
            inter_acc[...] = jnp.zeros_like(inter_acc)
            iarea_acc[...] = jnp.zeros_like(iarea_acc)
            tarea_acc[...] = jnp.zeros_like(tarea_acc)

        # tiny class-id iota; the compare broadcasts it (no full-size iota)
        cls = jax.lax.broadcasted_iota(jnp.int32, (1, C, 1, 1), 1)

        def fold(v):
            # fold TS rows into the 8-sublane accumulator with VALU adds
            if fold_groups:
                return jnp.sum(v.reshape(B, C, fold_groups, 8, _LANES), axis=2)
            return v                                    # acc_rows == ts

        def accumulate(row_mask):
            x = x_ref[...]                              # (B, C, ts, 128) native dtype
            t = t_ref[...].astype(jnp.int32)            # (B, ts, 128), in-register upcast
            # BinaryDiceLoss argmax over cat([1 - x, x], dim=1)  ==  (x > 0.5)
            pred = (x > 0.5).astype(jnp.float32)
            tmask = (t[:, None, :, :] == cls).astype(jnp.float32)
            if row_mask is not None:
                pred = pred * row_mask
                tmask = tmask * row_mask
            inter_acc[...] += fold(pred * tmask)
            iarea_acc[...] += fold(pred)
            tarea_acc[...] += fold(tmask)

        if not ragged:
            accumulate(None)                            # hot path: no masking
        else:
            blk = pl.program_id(0) * steps_per_part + j
            row_start = blk * ts
            is_full = row_start + ts <= rows

            @pl.when(is_full)
            def _():
                accumulate(None)                        # hot path: no masking

            @pl.when(jnp.logical_not(is_full))
            def _():
                valid = rows - row_start                # may be <= 0 (skip block)
                ridx = jax.lax.broadcasted_iota(jnp.int32, (ts, _LANES), 0)
                accumulate((ridx < valid).astype(jnp.float32))

        @pl.when(j == pl.num_programs(1) - 1)
        def _():
            def reduce_acc(acc):
                # rows/sublanes first (cheap adds), lanes last (one small XLU reduce)
                return jnp.sum(jnp.sum(acc[...], axis=2), axis=-1)   # (B, C)

            inter_ref[...] = reduce_acc(inter_acc)[None]
            iarea_ref[...] = reduce_acc(iarea_acc)[None]
            tarea_ref[...] = reduce_acc(tarea_acc)[None]

    return kernel


def _forward_impl(x_in, target, weights, row_tile=None):
    B = x_in.shape[0]
    C = x_in.shape[1]
    N = int(math.prod(x_in.shape[2:]))

    x = x_in.reshape(B, C, N)                     # free reshape, native dtype
    if x.dtype == jnp.float64:
        x = x.astype(jnp.float32)
    t = target.reshape(B, N)
    if t.dtype not in (jnp.int8, jnp.uint8, jnp.int32):
        t = t.astype(jnp.int32)                   # e.g. int64 / bool labels

    pad = (-N) % _LANES
    if pad:                                       # rare: only when N % 128 != 0
        x = jnp.pad(x, ((0, 0), (0, 0), (0, pad)))                  # pred -> 0
        if t.dtype != jnp.int32:
            t = t.astype(jnp.int32)
        t = jnp.pad(t, ((0, 0), (0, pad)), constant_values=-1)      # no class
    rows = (N + pad) // _LANES
    x = x.reshape(B, C, rows, _LANES)
    t = t.reshape(B, rows, _LANES)

    x_isize = x.dtype.itemsize
    t_isize = t.dtype.itemsize
    cap, budget = _vmem_caps()
    num_parts = _device_num_parts()
    if row_tile is None:
        ts = _choose_row_tile(B, C, rows, x_isize, t_isize, budget, num_parts)
    else:
        ts = min(int(row_tile), rows)
        if ts < rows:
            ts = max(8, (ts // 8) * 8)

    nblocks = pl.cdiv(rows, ts)
    num_parts = min(num_parts, nblocks)
    steps = pl.cdiv(nblocks, num_parts)
    ragged = num_parts * steps * ts > rows        # partial / skipped tail tiles
    overrun = num_parts * steps > nblocks         # wholly out-of-range block ids
    acc_rows = 8 if ts % 8 == 0 else ts

    def blk_idx(p, j):
        b = p * steps + j
        return jnp.minimum(b, nblocks - 1) if overrun else b

    x_map = lambda p, j: (0, 0, blk_idx(p, j), 0)
    t_map = lambda p, j: (0, blk_idx(p, j), 0)
    out_map = lambda p, j: (p, 0, 0)

    # explicit VMEM plan -> vmem_limit_bytes (protects the tiling on v5e's
    # 16 MiB default and allows the larger tiles on v6e/v7x)
    x_blk_bytes = B * C * ts * _LANES * x_isize
    t_blk_bytes = B * ts * _LANES * t_isize
    acc_bytes = 3 * B * C * acc_rows * _LANES * 4
    plan = 2 * x_blk_bytes + 2 * t_blk_bytes + acc_bytes
    vmem_limit = int(max(16 << 20, min(cap * 3 // 4, plan + (8 << 20))))

    out_sds = jax.ShapeDtypeStruct((num_parts, B, C), jnp.float32)
    kernel = _make_dice_sums_kernel(B, C, ts, rows, steps, ragged, acc_rows)
    inter, iarea, tarea = pl.pallas_call(
        kernel,
        out_shape=(out_sds, out_sds, out_sds),
        grid_spec=pltpu.PrefetchScalarGridSpec(
            num_scalar_prefetch=0,
            grid=(num_parts, steps),
            in_specs=[
                pl.BlockSpec((B, C, ts, _LANES), x_map),   # probs, native dtype
                pl.BlockSpec((B, ts, _LANES), t_map),      # labels, native int dtype
            ],
            out_specs=(
                pl.BlockSpec((1, B, C), out_map),
                pl.BlockSpec((1, B, C), out_map),
                pl.BlockSpec((1, B, C), out_map),
            ),
            scratch_shapes=[pltpu.VMEM((B, C, acc_rows, _LANES), jnp.float32)] * 3,
        ),
        compiler_params=pltpu.CompilerParams(
            dimension_semantics=("parallel", "arbitrary"),
            vmem_limit_bytes=vmem_limit),
    )(x, t)

    inter = jnp.sum(inter, axis=0)                # (B, C)
    iarea = jnp.sum(iarea, axis=0)
    tarea = jnp.sum(tarea, axis=0)

    eps = 1e-6
    batch_loss = 1.0 - 2.0 * inter / (iarea + tarea + 2.0 * eps)
    # exact compare is safe: tarea is a sum of exact 0/1 values in f32
    batch_loss = jnp.where(tarea == 0.0, 0.0, batch_loss)
    per_class = jnp.mean(batch_loss, axis=0)      # (C,)
    wloss = jnp.sum(per_class * weights)
    return wloss, per_class


_forward = jax.jit(_forward_impl, static_argnames=("row_tile",))


class MultiDiceLossPallas:
    """JAX/Pallas equivalent of the PyTorch MultiDiceLoss module (forward)."""

    def __init__(self, weights, num_class):
        w = jnp.asarray(weights, jnp.float32)
        assert w.shape[0] == num_class, "the length of weight must equal to num_class"
        self.num_class = num_class
        self.weights = w / jnp.sum(w)             # normalized, like the torch module

    def __call__(self, input_tensor, target):
        assert input_tensor.shape[1] == self.num_class
        wloss, per_class = _forward(input_tensor, target, self.weights)
        # single host sync for the per-class list (matches torch .item() list)
        per_class_host = jax.device_get(per_class)
        dice_losses = [float(v) for v in per_class_host]
        return wloss, dice_losses


def _reference_multi_dice(input_tensor, target, weights):
    """Pure-JAX reference of the PyTorch forward, for verification."""
    w = jnp.asarray(weights, jnp.float32)
    w = w / jnp.sum(w)
    B, C = input_tensor.shape[0], input_tensor.shape[1]
    t = jnp.reshape(target, (B, -1)).astype(jnp.int32)
    total = 0.0
    per_class = []
    for i in range(C):
        s = input_tensor[:, i].reshape(B, -1)
        pred = (s > 0.5).astype(jnp.float32)
        tmask = (t == i).astype(jnp.float32)
        intersect = jnp.sum(pred * tmask, axis=1)
        ia = jnp.sum(pred, axis=1)
        ta = jnp.sum(tmask, axis=1)
        bl = 1.0 - 2.0 * intersect / (ia + ta + 2e-6)
        bl = jnp.where(ta == 0.0, 0.0, bl)
        li = jnp.mean(bl)
        per_class.append(li)
        total = total + li * w[i]
    return total, per_class


if __name__ == "__main__":
    key = jax.random.PRNGKey(0)
    B, C, H, W = 2, 4, 16, 16
    k1, k2, k3, k4 = jax.random.split(key, 4)

    # deterministic example inputs (full-extent single-block path)
    x = jax.random.uniform(k1, (B, C, H, W), dtype=jnp.float32)       # per-class probs
    target = jax.random.randint(k2, (B, 1, H, W), 0, C, dtype=jnp.int32)
    weights = [1.0, 2.0, 3.0, 4.0]

    loss_fn = MultiDiceLossPallas(weights, C)
    wloss, dice_losses = loss_fn(x, target)
    wloss = jax.block_until_ready(wloss)

    ref_wloss, ref_per_class = _reference_multi_dice(x, target, weights)
    assert abs(float(wloss) - float(ref_wloss)) < 1e-5
    for a, b in zip(dice_losses, ref_per_class):
        assert abs(float(a) - float(b)) < 1e-5

    # second case: forces the tiled path with a ragged (masked) tail tile and
    # an absent class (tarea == 0) in batch 0
    H2 = W2 = 80                                   # N = 6400 -> 50 rows of 128 lanes
    x2 = jax.random.uniform(k3, (B, C, H2, W2), dtype=jnp.float32)
    t2 = jax.random.randint(k4, (B, 1, H2, W2), 0, C, dtype=jnp.int32)
    t2 = t2.at[0].set(jnp.clip(t2[0], 0, C - 2))   # class C-1 missing in batch 0
    w2 = jnp.asarray(weights, jnp.float32)
    w2 = w2 / jnp.sum(w2)
    wloss2, per_class2 = _forward(x2, t2, w2, row_tile=32)
    wloss2 = jax.block_until_ready(wloss2)
    ref_wloss2, ref_pc2 = _reference_multi_dice(x2, t2, weights)
    assert abs(float(wloss2) - float(ref_wloss2)) < 1e-5
    per_class2 = jax.device_get(per_class2)
    for a, b in zip(per_class2, ref_pc2):
        assert abs(float(a) - float(b)) < 1e-5

    # TODO(synk): forward-only port; torch autograd (save_for_backward) and
    # the custom backward of BinaryDiceLoss are not implemented.
    print("KERNEL_OK")
</pallas_src>

<mosaic_0001>
module attributes {stable_mosaic.version = 11 : i64} {
  func.func @kernel(%arg0: i32, %arg1: i32, %arg2: memref<2x4x2x128xf32, #tpu.memory_space<vmem>>, %arg3: memref<2x2x128xi32, #tpu.memory_space<vmem>>, %arg4: memref<1x2x4xf32, #tpu.memory_space<vmem>>, %arg5: memref<1x2x4xf32, #tpu.memory_space<vmem>>, %arg6: memref<1x2x4xf32, #tpu.memory_space<vmem>>, %arg7: memref<2x4x2x128xf32, #tpu.memory_space<vmem>>, %arg8: memref<2x4x2x128xf32, #tpu.memory_space<vmem>>, %arg9: memref<2x4x2x128xf32, #tpu.memory_space<vmem>>) attributes {dimension_semantics = [#tpu.dimension_semantics<parallel>, #tpu.dimension_semantics<arbitrary>], iteration_bounds = array<i64: 1, 1>, scalar_prefetch = 0 : i64, scratch_operands = 3 : i64, tpu.core_type = #tpu.core_type<tc>, window_params = [{transform_indices = @transform_0, window_bounds = array<i64: 2, 4, 2, 128>}, {transform_indices = @transform_1, window_bounds = array<i64: 2, 2, 128>}, {transform_indices = @transform_2, window_bounds = array<i64: 1, 2, 4>}, {transform_indices = @transform_3, window_bounds = array<i64: 1, 2, 4>}, {transform_indices = @transform_4, window_bounds = array<i64: 1, 2, 4>}]} {
    %c0_i32 = arith.constant 0 : i32
    %0 = arith.cmpi eq, %arg1, %c0_i32 : i32
    %1 = arith.extui %0 : i1 to i32
    %c0_i32_0 = arith.constant 0 : i32
    %2 = arith.cmpi ne, %1, %c0_i32_0 : i32
    scf.if %2 {
      %cst_33 = arith.constant 0.000000e+00 : f32
      %29 = vector.broadcast %cst_33 : f32 to vector<2x4x2x128xf32>
      %c0_34 = arith.constant 0 : index
      %c0_35 = arith.constant 0 : index
      %c0_36 = arith.constant 0 : index
      %c0_37 = arith.constant 0 : index
      %30 = vector.load %arg7[%c0_34, %c0_35, %c0_36, %c0_37] : memref<2x4x2x128xf32, #tpu.memory_space<vmem>>, vector<2x4x2x128xf32>
      tpu.vector_store %arg7[%c0_34, %c0_35, %c0_36, %c0_37], %29 {strides = array<i32>} : memref<2x4x2x128xf32, #tpu.memory_space<vmem>>, vector<2x4x2x128xf32>,
      %cst_38 = arith.constant 0.000000e+00 : f32
      %31 = vector.broadcast %cst_38 : f32 to vector<2x4x2x128xf32>
      %c0_39 = arith.constant 0 : index
      %c0_40 = arith.constant 0 : index
      %c0_41 = arith.constant 0 : index
      %c0_42 = arith.constant 0 : index
      %32 = vector.load %arg8[%c0_39, %c0_40, %c0_41, %c0_42] : memref<2x4x2x128xf32, #tpu.memory_space<vmem>>, vector<2x4x2x128xf32>
      tpu.vector_store %arg8[%c0_39, %c0_40, %c0_41, %c0_42], %31 {strides = array<i32>} : memref<2x4x2x128xf32, #tpu.memory_space<vmem>>, vector<2x4x2x128xf32>,
      %cst_43 = arith.constant 0.000000e+00 : f32
      %33 = vector.broadcast %cst_43 : f32 to vector<2x4x2x128xf32>
      %c0_44 = arith.constant 0 : index
      %c0_45 = arith.constant 0 : index
      %c0_46 = arith.constant 0 : index
      %c0_47 = arith.constant 0 : index
      %34 = vector.load %arg9[%c0_44, %c0_45, %c0_46, %c0_47] : memref<2x4x2x128xf32, #tpu.memory_space<vmem>>, vector<2x4x2x128xf32>
      tpu.vector_store %arg9[%c0_44, %c0_45, %c0_46, %c0_47], %33 {strides = array<i32>} : memref<2x4x2x128xf32, #tpu.memory_space<vmem>>, vector<2x4x2x128xf32>,
    } else {
    }
    %3 = tpu.iota {dimensions = array<i32: 1>} : vector<1x4x1x1xi32>
    %c0 = arith.constant 0 : index
    %c0_1 = arith.constant 0 : index
    %c0_2 = arith.constant 0 : index
    %c0_3 = arith.constant 0 : index
    %4 = vector.load %arg2[%c0, %c0_1, %c0_2, %c0_3] : memref<2x4x2x128xf32, #tpu.memory_space<vmem>>, vector<2x4x2x128xf32>
    %c0_4 = arith.constant 0 : index
    %c0_5 = arith.constant 0 : index
    %c0_6 = arith.constant 0 : index
    %5 = vector.load %arg3[%c0_4, %c0_5, %c0_6] : memref<2x2x128xi32, #tpu.memory_space<vmem>>, vector<2x2x128xi32>
    %cst = arith.constant 5.000000e-01 : f32
    %6 = vector.broadcast %cst : f32 to vector<2x4x2x128xf32>
    %7 = arith.cmpf ogt, %4, %6 : vector<2x4x2x128xf32>
    %8 = arith.extui %7 : vector<2x4x2x128xi1> to vector<2x4x2x128xi32>
    %9 = arith.sitofp %8 : vector<2x4x2x128xi32> to vector<2x4x2x128xf32>
    %10 = vector.shape_cast %5 : vector<2x2x128xi32> to vector<2x1x2x128xi32>
    %11 = vector.broadcast %10 : vector<2x1x2x128xi32> to vector<2x4x2x128xi32>
    %12 = vector.broadcast %3 : vector<1x4x1x1xi32> to vector<2x4x2x128xi32>
    %13 = arith.cmpi eq, %11, %12 : vector<2x4x2x128xi32>
    %14 = arith.extui %13 : vector<2x4x2x128xi1> to vector<2x4x2x128xi32>
    %15 = arith.sitofp %14 : vector<2x4x2x128xi32> to vector<2x4x2x128xf32>
    %c0_7 = arith.constant 0 : index
    %c0_8 = arith.constant 0 : index
    %c0_9 = arith.constant 0 : index
    %c0_10 = arith.constant 0 : index
    %16 = vector.load %arg7[%c0_7, %c0_8, %c0_9, %c0_10] : memref<2x4x2x128xf32, #tpu.memory_space<vmem>>, vector<2x4x2x128xf32>
    %17 = arith.mulf %9, %15 : vector<2x4x2x128xf32>
    %18 = arith.addf %16, %17 : vector<2x4x2x128xf32>
    %c0_11 = arith.constant 0 : index
    %c0_12 = arith.constant 0 : index
    %c0_13 = arith.constant 0 : index
    %c0_14 = arith.constant 0 : index
    %19 = vector.load %arg7[%c0_11, %c0_12, %c0_13, %c0_14] : memref<2x4x2x128xf32, #tpu.memory_space<vmem>>, vector<2x4x2x128xf32>
    tpu.vector_store %arg7[%c0_11, %c0_12, %c0_13, %c0_14], %18 {strides = array<i32>} : memref<2x4x2x128xf32, #tpu.memory_space<vmem>>, vector<2x4x2x128xf32>,
    %c0_15 = arith.constant 0 : index
    %c0_16 = arith.constant 0 : index
    %c0_17 = arith.constant 0 : index
    %c0_18 = arith.constant 0 : index
    %20 = vector.load %arg8[%c0_15, %c0_16, %c0_17, %c0_18] : memref<2x4x2x128xf32, #tpu.memory_space<vmem>>, vector<2x4x2x128xf32>
    %21 = arith.addf %20, %9 : vector<2x4x2x128xf32>
    %c0_19 = arith.constant 0 : index
    %c0_20 = arith.constant 0 : index
    %c0_21 = arith.constant 0 : index
    %c0_22 = arith.constant 0 : index
    %22 = vector.load %arg8[%c0_19, %c0_20, %c0_21, %c0_22] : memref<2x4x2x128xf32, #tpu.memory_space<vmem>>, vector<2x4x2x128xf32>
    tpu.vector_store %arg8[%c0_19, %c0_20, %c0_21, %c0_22], %21 {strides = array<i32>} : memref<2x4x2x128xf32, #tpu.memory_space<vmem>>, vector<2x4x2x128xf32>,
    %c0_23 = arith.constant 0 : index
    %c0_24 = arith.constant 0 : index
    %c0_25 = arith.constant 0 : index
    %c0_26 = arith.constant 0 : index
    %23 = vector.load %arg9[%c0_23, %c0_24, %c0_25, %c0_26] : memref<2x4x2x128xf32, #tpu.memory_space<vmem>>, vector<2x4x2x128xf32>
    %24 = arith.addf %23, %15 : vector<2x4x2x128xf32>
    %c0_27 = arith.constant 0 : index
    %c0_28 = arith.constant 0 : index
    %c0_29 = arith.constant 0 : index
    %c0_30 = arith.constant 0 : index
    %25 = vector.load %arg9[%c0_27, %c0_28, %c0_29, %c0_30] : memref<2x4x2x128xf32, #tpu.memory_space<vmem>>, vector<2x4x2x128xf32>
    tpu.vector_store %arg9[%c0_27, %c0_28, %c0_29, %c0_30], %24 {strides = array<i32>} : memref<2x4x2x128xf32, #tpu.memory_space<vmem>>, vector<2x4x2x128xf32>,
    %c0_i32_31 = arith.constant 0 : i32
    %26 = arith.cmpi eq, %arg1, %c0_i32_31 : i32
    %27 = arith.extui %26 : i1 to i32
    %c0_i32_32 = arith.constant 0 : i32
    %28 = arith.cmpi ne, %27, %c0_i32_32 : i32
    scf.if %28 {
      %c0_33 = arith.constant 0 : index
      %c0_34 = arith.constant 0 : index
      %c0_35 = arith.constant 0 : index
      %c0_36 = arith.constant 0 : index
      %29 = vector.load %arg7[%c0_33, %c0_34, %c0_35, %c0_36] : memref<2x4x2x128xf32, #tpu.memory_space<vmem>>, vector<2x4x2x128xf32>
      %cst_37 = arith.constant dense<0.000000e+00> : vector<2x4x128xf32>
      %30 = vector.multi_reduction <add>, %29, %cst_37 [2] : vector<2x4x2x128xf32> to vector<2x4x128xf32>
      %cst_38 = arith.constant dense<0.000000e+00> : vector<2x4xf32>
      %31 = vector.multi_reduction <add>, %30, %cst_38 [2] : vector<2x4x128xf32> to vector<2x4xf32>
      %32 = vector.shape_cast %31 : vector<2x4xf32> to vector<1x2x4xf32>
      %c0_39 = arith.constant 0 : index
      %c0_40 = arith.constant 0 : index
      %c0_41 = arith.constant 0 : index
      %33 = vector.load %arg4[%c0_39, %c0_40, %c0_41] : memref<1x2x4xf32, #tpu.memory_space<vmem>>, vector<1x2x4xf32>
      tpu.vector_store %arg4[%c0_39, %c0_40, %c0_41], %32 {strides = array<i32>} : memref<1x2x4xf32, #tpu.memory_space<vmem>>, vector<1x2x4xf32>,
      %c0_42 = arith.constant 0 : index
      %c0_43 = arith.constant 0 : index
      %c0_44 = arith.constant 0 : index
      %c0_45 = arith.constant 0 : index
      %34 = vector.load %arg8[%c0_42, %c0_43, %c0_44, %c0_45] : memref<2x4x2x128xf32, #tpu.memory_space<vmem>>, vector<2x4x2x128xf32>
      %cst_46 = arith.constant dense<0.000000e+00> : vector<2x4x128xf32>
      %35 = vector.multi_reduction <add>, %34, %cst_46 [2] : vector<2x4x2x128xf32> to vector<2x4x128xf32>
      %cst_47 = arith.constant dense<0.000000e+00> : vector<2x4xf32>
      %36 = vector.multi_reduction <add>, %35, %cst_47 [2] : vector<2x4x128xf32> to vector<2x4xf32>
      %37 = vector.shape_cast %36 : vector<2x4xf32> to vector<1x2x4xf32>
      %c0_48 = arith.constant 0 : index
      %c0_49 = arith.constant 0 : index
      %c0_50 = arith.constant 0 : index
      %38 = vector.load %arg5[%c0_48, %c0_49, %c0_50] : memref<1x2x4xf32, #tpu.memory_space<vmem>>, vector<1x2x4xf32>
      tpu.vector_store %arg5[%c0_48, %c0_49, %c0_50], %37 {strides = array<i32>} : memref<1x2x4xf32, #tpu.memory_space<vmem>>, vector<1x2x4xf32>,
      %c0_51 = arith.constant 0 : index
      %c0_52 = arith.constant 0 : index
      %c0_53 = arith.constant 0 : index
      %c0_54 = arith.constant 0 : index
      %39 = vector.load %arg9[%c0_51, %c0_52, %c0_53, %c0_54] : memref<2x4x2x128xf32, #tpu.memory_space<vmem>>, vector<2x4x2x128xf32>
      %cst_55 = arith.constant dense<0.000000e+00> : vector<2x4x128xf32>
      %40 = vector.multi_reduction <add>, %39, %cst_55 [2] : vector<2x4x2x128xf32> to vector<2x4x128xf32>
      %cst_56 = arith.constant dense<0.000000e+00> : vector<2x4xf32>
      %41 = vector.multi_reduction <add>, %40, %cst_56 [2] : vector<2x4x128xf32> to vector<2x4xf32>
      %42 = vector.shape_cast %41 : vector<2x4xf32> to vector<1x2x4xf32>
      %c0_57 = arith.constant 0 : index
      %c0_58 = arith.constant 0 : index
      %c0_59 = arith.constant 0 : index
      %43 = vector.load %arg6[%c0_57, %c0_58, %c0_59] : memref<1x2x4xf32, #tpu.memory_space<vmem>>, vector<1x2x4xf32>
      tpu.vector_store %arg6[%c0_57, %c0_58, %c0_59], %42 {strides = array<i32>} : memref<1x2x4xf32, #tpu.memory_space<vmem>>, vector<1x2x4xf32>,
    } else {
    }
    return
  }
  func.func @transform_0(%arg0: i32, %arg1: i32) -> (i32, i32, i32, i32) {
    %c1_i32 = arith.constant 1 : i32
    %0 = arith.muli %arg0, %c1_i32 : i32
    %1 = arith.addi %0, %arg1 : i32
    %c0_i32 = arith.constant 0 : i32
    %c0_i32_0 = arith.constant 0 : i32
    %c0_i32_1 = arith.constant 0 : i32
    %c0_i32_2 = arith.constant 0 : i32
    return %c0_i32, %c0_i32_0, %1, %c0_i32_1 : i32, i32, i32, i32
  }
  func.func @transform_1(%arg0: i32, %arg1: i32) -> (i32, i32, i32) {
    %c1_i32 = arith.constant 1 : i32
    %0 = arith.muli %arg0, %c1_i32 : i32
    %1 = arith.addi %0, %arg1 : i32
    %c0_i32 = arith.constant 0 : i32
    %c0_i32_0 = arith.constant 0 : i32
    %c0_i32_1 = arith.constant 0 : i32
    return %c0_i32, %1, %c0_i32_0 : i32, i32, i32
  }
  func.func @transform_2(%arg0: i32, %arg1: i32) -> (i32, i32, i32) {
    %c0_i32 = arith.constant 0 : i32
    %c0_i32_0 = arith.constant 0 : i32
    %c0_i32_1 = arith.constant 0 : i32
    return %arg0, %c0_i32, %c0_i32_0 : i32, i32, i32
  }
  func.func @transform_3(%arg0: i32, %arg1: i32) -> (i32, i32, i32) {
    %c0_i32 = arith.constant 0 : i32
    %c0_i32_0 = arith.constant 0 : i32
    %c0_i32_1 = arith.constant 0 : i32
    return %arg0, %c0_i32, %c0_i32_0 : i32, i32, i32
  }
  func.func @transform_4(%arg0: i32, %arg1: i32) -> (i32, i32, i32) {
    %c0_i32 = arith.constant 0 : i32
    %c0_i32_0 = arith.constant 0 : i32
    %c0_i32_1 = arith.constant 0 : i32
    return %arg0, %c0_i32, %c0_i32_0 : i32, i32, i32
  }
}

</mosaic_0001>

<bundles_post_ra>
// kernel: _forward_impl.1
= control target key start
LH: loop header
LB: loop body
LE: loop exit
PB: predicated region body
PF: predicated region fallthrough
CT: control target
= control target key end

     0   :  { %v545_v0 = vmov 0.0   ;;  %vm225_vm9 = vcmask 1041408   ;;  %vm290_vm13 = vcmask 1041409   ;;  %vm292_vm14 = vcmask 1042434   ;;  %s746_s1 = inlined_call_operand.vmem [shape: s32[2,2,128], index: 1, kind: input, shape index: {}]   ;;  %s747_s0 = inlined_call_operand.vmem [shape: f32[2,4,2,128], index: 0, kind: input, shape index: {}]   ;;  %s748_s4 = inlined_call_operand.vmem [shape: f32[1,2,4], index: 4, kind: output, shape index: {2}]   ;;  %s749_s3 = inlined_call_operand.vmem [shape: f32[1,2,4], index: 3, kind: output, shape index: {1}]   ;;  %s750_s2 = inlined_call_operand.vmem [shape: f32[1,2,4], index: 2, kind: output, shape index: {0}]  }
   0x1   :  { %68 = vst [vmem:[#allocation4] sm:$0x3] %v545_v0  ;;  %v84_v1 = vld [vmem:[%s746_s1] sm:$0x3]  ;;  %v77_v10 = vld [vmem:[%s747_s0 + $0x2] sm:$0x3] }
   0x2   :  { %69 = vst [vmem:[#allocation4 + $0x2] sm:$0x3] %v545_v0  ;;  %vm110_vm0 = vcmp.eq.s32.totalorder %v84_v1, 0  ;;  %vm111_vm1 = vcmp.eq.s32.totalorder %v84_v1, 1  ;;  %vm112_vm2 = vcmp.eq.s32.totalorder %v84_v1, 2  ;;  %vm113_vm3 = vcmp.eq.s32.totalorder %v84_v1, 3 }
   0x3   :  { %70 = vst [vmem:[#allocation4 + $0x4] sm:$0x3] %v545_v0  ;;  %v536_v2 = vsel %vm110_vm0, 1.0, %v545_v0  ;;  %v537_v3 = vsel %vm111_vm1, 1.0, %v545_v0  ;;  %v583_v4 = vsel %vm112_vm2, 1.0, %v545_v0  ;;  %v586_v5 = vsel %vm113_vm3, 1.0, %v545_v0 }
   0x4   :  { %71 = vst [vmem:[#allocation4 + $0x6] sm:$0x3] %v545_v0  ;;  %v76_v7 = vld [vmem:[%s747_s0] sm:$0x3]  ;;  %v78_v13 = vld [vmem:[%s747_s0 + $0x4] sm:$0x3] }
   0x5   :  { %52 = vst [vmem:[#allocation2] sm:$0x3] %v545_v0  ;;  %v79_v16 = vld [vmem:[%s747_s0 + $0x6] sm:$0x3]  ;;  %v85_v18 = vld [vmem:[%s746_s1 + $0x2] sm:$0x3] }
   0x6   :  { %53 = vst [vmem:[#allocation2 + $0x2] sm:$0x3] %v545_v0  ;;  %vm86_vm4 = vcmp.gt.f32.partialorder %v76_v7, 0.5  ;;  %vm87_vm5 = vcmp.gt.f32.partialorder %v77_v10, 0.5  ;;  %vm88_vm6 = vcmp.gt.f32.partialorder %v78_v13, 0.5  ;;  %vm89_vm7 = vcmp.gt.f32.partialorder %v79_v16, 0.5 }
   0x7   :  { %54 = vst [vmem:[#allocation2 + $0x4] sm:$0x3] %v545_v0  ;;  %vm114_vm8 = vcmp.eq.s32.totalorder %v85_v18, 0  ;;  %v528_v19 = vsel %vm86_vm4, 1.0, %v545_v0  ;;  %vm115_vm10 = vcmp.eq.s32.totalorder %v85_v18, 1  ;;  %v529_v20 = vsel %vm87_vm5, 1.0, %v545_v0 }
   0x8   :  { %v190_v6 = vld [vmem:[#allocation4] sm:$0x3]  ;;  %55 = vst [vmem:[#allocation2 + $0x6] sm:$0x3] %v545_v0  ;;  %v615_v21 = vsel %vm88_vm6, 1.0, %v545_v0  ;;  %v618_v22 = vsel %vm89_vm7, 1.0, %v545_v0  ;;  %v142_v32 = vmul.f32 %v536_v2, %v528_v19  ;;  %v143_v37 = vmul.f32 %v537_v3, %v529_v20 }
   0x9   :  { %v191_v8 = vld [vmem:[#allocation4 + $0x2] sm:$0x3]  ;;  %v198_v9 = vadd.f32 %v536_v2, %v190_v6  ;;  %56 = vst [vmem:[#allocation2 + $0x8] sm:$0x3] %v545_v0  ;;  %vm116_vm11 = vcmp.eq.s32.totalorder %v85_v18, 2  ;;  %vm117_vm12 = vcmp.eq.s32.totalorder %v85_v18, 3  ;;  %v144_v42 = vmul.f32 %v583_v4, %v615_v21 }
   0xa   :  { %v192_v11 = vld [vmem:[#allocation4 + $0x4] sm:$0x3]  ;;  %v199_v12 = vadd.f32 %v537_v3, %v191_v8  ;;  %57 = vst [vmem:[#allocation2 + $0xa] sm:$0x3] %v545_v0  ;;  %v622_v24 = vsel %vm114_vm8, 1.0, %v545_v0  ;;  %v627_v28 = vsel %vm115_vm10, 1.0, %v545_v0  ;;  %v145_v46 = vmul.f32 %v586_v5, %v618_v22 }
   0xb   :  { %v193_v14 = vld [vmem:[#allocation4 + $0x6] sm:$0x3]  ;;  %v200_v15 = vadd.f32 %v583_v4, %v192_v11  ;;  %206 = vst [vmem:[#allocation4] sm:$0x3] %v198_v9  ;;  %v634_v33 = vld [vmem:[%s747_s0 + $0x8] sm:$0x3] }
   0xc   :  { %v201_v17 = vadd.f32 %v586_v5, %v193_v14  ;;  %207 = vst [vmem:[#allocation4 + $0x2] sm:$0x3] %v199_v12  ;;  %v134_v27 = vld [vmem:[#allocation2] sm:$0x3]  ;;  %v81_v38 = vld [vmem:[%s747_s0 + $0xa] sm:$0x3] }
   0xd   :  { %208 = vst [vmem:[#allocation4 + $0x4] sm:$0x3] %v200_v15  ;;  %v82_v43 = vld [vmem:[%s747_s0 + $0xc] sm:$0x3]  ;;  %v653_v47 = vsel %vm116_vm11, 1.0, %v545_v0  ;;  %vm294_vm15 = vcmask 1043459   ;;  %v150_v54 = vadd.f32 %v142_v32, %v134_v27 }
   0xe   :  { %209 = vst [vmem:[#allocation4 + $0x6] sm:$0x3] %v201_v17  ;;  %v83_v48 = vld [vmem:[%s747_s0 + $0xe] sm:$0x3]  ;;  %v135_v52 = vld [vmem:[#allocation2 + $0x2] sm:$0x3] }
   0xf   :  { %58 = vst [vmem:[#allocation2 + $0xc] sm:$0x3] %v545_v0  ;;  %v136_v53 = vld [vmem:[#allocation2 + $0x4] sm:$0x3]  ;;  %v661_v55 = vsel %vm117_vm12, 1.0, %v545_v0  ;;  %vm301_vm0 = vcmask 1043456   ;;  %v151_v11 = vadd.f32 %v143_v37, %v135_v52 }
  0x10   :  { %59 = vst [vmem:[#allocation2 + $0xe] sm:$0x3] %v545_v0  ;;  %vm90_vm1 = vcmp.gt.f32.partialorder %v634_v33, 0.5  ;;  %vm91_vm2 = vcmp.gt.f32.partialorder %v81_v38, 0.5  ;;  %vm92_vm3 = vcmp.gt.f32.partialorder %v82_v43, 0.5  ;;  %vm93_vm4 = vcmp.gt.f32.partialorder %v83_v48, 0.5 }
  0x11   :  { %60 = vst [vmem:[#allocation3] sm:$0x3] %v545_v0  ;;  %v137_v10 = vld [vmem:[#allocation2 + $0x6] sm:$0x3]  ;;  %v152_v12 = vadd.f32 %v144_v42, %v136_v53  ;;  %v532_v15 = vsel %vm90_vm1, 1.0, %v545_v0  ;;  %v533_v16 = vsel %vm91_vm2, 1.0, %v545_v0 }
  0x12   :  { %v411_v23 = vld [vmem:[#allocation4] sm:$0x3]  ;;  %61 = vst [vmem:[#allocation3 + $0x2] sm:$0x3] %v545_v0  ;;  %v139_v33 = vld [vmem:[#allocation2 + $0xa] sm:$0x3] }
  0x13   :  { %v412_v25 = vld [vmem:[#allocation4 + $0x2] sm:$0x3]  ;;  %v419_v26 = vsel %vm225_vm9, %v411_v23, 0.0  ;;  %62 = vst [vmem:[#allocation3 + $0x4] sm:$0x3] %v545_v0  ;;  %vm316_vm5 = vcmask 25600  }
  0x14   :  { %v413_v29 = vld [vmem:[#allocation4 + $0x4] sm:$0x3]  ;;  %v420_v30 = vrot.slane %v419_v26, 4  ;;  %v426_v31 = vsel %vm225_vm9, %v412_v25, 0.0  ;;  %63 = vst [vmem:[#allocation3 + $0x6] sm:$0x3] %v545_v0 }
  0x15   :  { %v414_v34 = vld [vmem:[#allocation4 + $0x6] sm:$0x3]  ;;  %v427_v35 = vrot.slane %v426_v31, 4  ;;  %v433_v36 = vsel %vm225_vm9, %v413_v29, 0.0  ;;  %64 = vst [vmem:[#allocation3 + $0x8] sm:$0x3] %v545_v0 }
  0x16   :  { %v421_v39 = vadd.f32 %v420_v30, %v419_v26  ;;  %v434_v40 = vrot.slane %v433_v36, 4  ;;  %v440_v41 = vsel %vm225_vm9, %v414_v34, 0.0  ;;  %65 = vst [vmem:[#allocation3 + $0xa] sm:$0x3] %v545_v0  ;;  %v138_v26 = vld [vmem:[#allocation2 + $0x8] sm:$0x3]  ;;  %v146_v34 = vmul.f32 %v622_v24, %v532_v15 }
  0x17   :  { %v428_v44 = vadd.f32 %v427_v35, %v426_v31  ;;  %v441_v45 = vrot.slane %v440_v41, 4  ;;  %66 = vst [vmem:[#allocation3 + $0xc] sm:$0x3] %v545_v0  ;;  %v140_v43 = vld [vmem:[#allocation2 + $0xc] sm:$0x3] }
  0x18   :  { %v422_v49 = vrot.slane %v421_v39, 2  ;;  %v435_v50 = vadd.f32 %v434_v40, %v433_v36  ;;  %67 = vst [vmem:[#allocation3 + $0xe] sm:$0x3] %v545_v0  ;;  %v166_v51 = vld [vmem:[#allocation3] sm:$0x3]  ;;  %v154_v52 = vadd.f32 %v146_v34, %v138_v26 }
  0x19   :  { %v429_v56 = vrot.slane %v428_v44, 2  ;;  %v442_v57 = vadd.f32 %v441_v45, %v440_v41  ;;  %72 = vst [vmem:[#allocation4 + $0x8] sm:$0x3] %v545_v0  ;;  %v167_v58 = vld [vmem:[#allocation3 + $0x2] sm:$0x3]  ;;  %v174_v59 = vadd.f32 %v528_v19, %v166_v51  ;;  %v534_v19 = vsel %vm92_vm3, 1.0, %v545_v0 }
  0x1a   :  { %v423_v60 = vadd.f32 %v422_v49, %v421_v39  ;;  %v436_v61 = vrot.slane %v435_v50, 2  ;;  %73 = vst [vmem:[#allocation4 + $0xa] sm:$0x3] %v545_v0  ;;  %v168_v62 = vld [vmem:[#allocation3 + $0x4] sm:$0x3]  ;;  %v175_v63 = vadd.f32 %v529_v20, %v167_v58  ;;  %v535_v20 = vsel %vm93_vm4, 1.0, %v545_v0 }
  0x1b   :  { %v430_v1 = vadd.f32 %v429_v56, %v428_v44  ;;  %v443_v2 = vrot.slane %v442_v57, 2  ;;  %74 = vst [vmem:[#allocation4 + $0xc] sm:$0x3] %v545_v0  ;;  %v169_v3 = vld [vmem:[#allocation3 + $0x6] sm:$0x3]  ;;  %v176_v4 = vadd.f32 %v615_v21, %v168_v62  ;;  %v147_v39 = vmul.f32 %v627_v28, %v533_v16 }
  0x1c   :  { %v424_v5 = vrot.slane %v423_v60, 1  ;;  %v437_v6 = vadd.f32 %v436_v61, %v435_v50  ;;  %75 = vst [vmem:[#allocation4 + $0xe] sm:$0x3] %v545_v0  ;;  %v177_v7 = vadd.f32 %v618_v22, %v169_v3  ;;  %v153_v22 = vadd.f32 %v145_v46, %v137_v10  ;;  %v170_v25 = vld [vmem:[#allocation3 + $0x8] sm:$0x3] }
  0x1d   :  { %v431_v8 = vrot.slane %v430_v1, 1  ;;  %v444_v9 = vadd.f32 %v443_v2, %v442_v57  ;;  %182 = vst [vmem:[#allocation3] sm:$0x3] %v174_v59  ;;  %v171_v32 = vld [vmem:[#allocation3 + $0xa] sm:$0x3]  ;;  %v148_v48 = vmul.f32 %v653_v47, %v534_v19  ;;  %v178_v50 = vadd.f32 %v532_v15, %v170_v25 }
  0x1e   :  { %v425_v13 = vadd.f32 %v424_v5, %v423_v60  ;;  %v438_v14 = vrot.slane %v437_v6, 1  ;;  %183 = vst [vmem:[#allocation3 + $0x2] sm:$0x3] %v175_v63  ;;  %v172_v37 = vld [vmem:[#allocation3 + $0xc] sm:$0x3]  ;;  %v149_v51 = vmul.f32 %v661_v55, %v535_v20  ;;  %v179_v57 = vadd.f32 %v533_v16, %v171_v32 }
  0x1f   :  { %v432_v17 = vadd.f32 %v431_v8, %v430_v1  ;;  %v445_v18 = vrot.slane %v444_v9, 1  ;;  %184 = vst [vmem:[#allocation3 + $0x4] sm:$0x3] %v176_v4  ;;  %v173_v38 = vld [vmem:[#allocation3 + $0xe] sm:$0x3]  ;;  %v155_v58 = vadd.f32 %v147_v39, %v139_v33  ;;  %v180_v61 = vadd.f32 %v534_v19, %v172_v37 }
  0x20   :  { %v439_v21 = vadd.f32 %v438_v14, %v437_v6  ;;  %185 = vst [vmem:[#allocation3 + $0x6] sm:$0x3] %v177_v7  ;;  %v194_v23 = vld [vmem:[#allocation4 + $0x8] sm:$0x3]  ;;  %v141_v46 = vld [vmem:[#allocation2 + $0xe] sm:$0x3]  ;;  %v181_v62 = vadd.f32 %v535_v20, %v173_v38  ;;  %v156_v3 = vadd.f32 %v148_v48, %v140_v43 }
  0x21   :  { %v446_v27 = vadd.f32 %v445_v18, %v444_v9  ;;  %v483_v29 = vsel %vm290_vm13, %v432_v17, %v425_v13  ;;  %158 = vst [vmem:[#allocation2] sm:$0x3] %v150_v54  ;;  %v195_v30 = vld [vmem:[#allocation4 + $0xa] sm:$0x3]  ;;  %v202_v31 = vadd.f32 %v622_v24, %v194_v23  ;;  %v157_v8 = vadd.f32 %v149_v51, %v141_v46 }
  0x22   :  { %v484_v35 = vsel %vm292_vm14, %v439_v21, %v483_v29  ;;  %159 = vst [vmem:[#allocation2 + $0x2] sm:$0x3] %v151_v11  ;;  %v196_v0 = vld [vmem:[#allocation4 + $0xc] sm:$0x3]  ;;  %v203_v36 = vadd.f32 %v627_v28, %v195_v30 }
  0x23   :  { %v485_v40 = vsel %vm294_vm15, %v446_v27, %v484_v35  ;;  %160 = vst [vmem:[#allocation2 + $0x4] sm:$0x3] %v152_v12  ;;  %v197_v41 = vld [vmem:[#allocation4 + $0xe] sm:$0x3]  ;;  %v204_v42 = vadd.f32 %v653_v47, %v196_v0 }
  0x24   :  { %v491_v44 = vsel %vm301_vm0, %v485_v40, 0.0  ;;  %v318_v24 = vld [vmem:[#allocation3] sm:$0x3]  ;;  %161 = vst [vmem:[#allocation2 + $0x6] sm:$0x3] %v153_v22  ;;  %v205_v45 = vadd.f32 %v661_v55, %v197_v41 }
  0x25   :  { %492 = vadd.xlane.f32.xlu2 %v491_v44  ;;  %v319_v49 = vld [vmem:[#allocation3 + $0x2] sm:$0x3]  ;;  %v326_v28 = vsel %vm225_vm9, %v318_v24, 0.0  ;;  %210 = vst [vmem:[#allocation4 + $0x8] sm:$0x3] %v202_v31 }
  0x26   :  { %v320_v53 = vld [vmem:[#allocation3 + $0x4] sm:$0x3]  ;;  %v327_v54 = vrot.slane %v326_v28, 4  ;;  %v333_v56 = vsel %vm225_vm9, %v319_v49, 0.0  ;;  %211 = vst [vmem:[#allocation4 + $0xa] sm:$0x3] %v203_v36 }
  0x27   :  { %v321_v59 = vld [vmem:[#allocation3 + $0x6] sm:$0x3]  ;;  %v334_v60 = vrot.slane %v333_v56, 4  ;;  %v340_v47 = vsel %vm225_vm9, %v320_v53, 0.0  ;;  %212 = vst [vmem:[#allocation4 + $0xc] sm:$0x3] %v204_v42 }
  0x28   :  { %v328_v63 = vadd.f32 %v327_v54, %v326_v28  ;;  %v341_v1 = vrot.slane %v340_v47, 4  ;;  %v347_v2 = vsel %vm225_vm9, %v321_v59, 0.0  ;;  %v217_v55 = vld [vmem:[#allocation2] sm:$0x3]  ;;  %213 = vst [vmem:[#allocation4 + $0xe] sm:$0x3] %v205_v45 }
  0x29   :  { %v335_v4 = vadd.f32 %v334_v60, %v333_v56  ;;  %v348_v5 = vrot.slane %v347_v2, 4  ;;  %v218_v6 = vld [vmem:[#allocation2 + $0x2] sm:$0x3]  ;;  %v226_v7 = vsel %vm225_vm9, %v217_v55, 0.0  ;;  %186 = vst [vmem:[#allocation3 + $0x8] sm:$0x3] %v178_v50 }
  0x2a   :  { %v329_v9 = vrot.slane %v328_v63, 2  ;;  %v342_v10 = vadd.f32 %v341_v1, %v340_v47  ;;  %v219_v11 = vld [vmem:[#allocation2 + $0x4] sm:$0x3]  ;;  %v227_v12 = vrot.slane %v226_v7, 4  ;;  %v233_v13 = vsel %vm225_vm9, %v218_v6, 0.0 }
  0x2b   :  { %v336_v14 = vrot.slane %v335_v4, 2  ;;  %v349_v15 = vadd.f32 %v348_v5, %v347_v2  ;;  %v220_v16 = vld [vmem:[#allocation2 + $0x6] sm:$0x3]  ;;  %v234_v17 = vrot.slane %v233_v13, 4  ;;  %v240_v18 = vsel %vm225_vm9, %v219_v11, 0.0 }
  0x2c   :  { %v330_v19 = vadd.f32 %v329_v9, %v328_v63  ;;  %v343_v20 = vrot.slane %v342_v10, 2  ;;  %v228_v21 = vadd.f32 %v227_v12, %v226_v7  ;;  %v241_v22 = vrot.slane %v240_v18, 4  ;;  %187 = vst [vmem:[#allocation3 + $0xa] sm:$0x3] %v179_v57  ;;  %v415_v36 = vld [vmem:[#allocation4 + $0x8] sm:$0x3] }
  0x2d   :  { %v337_v23 = vadd.f32 %v336_v14, %v335_v4  ;;  %v350_v25 = vrot.slane %v349_v15, 2  ;;  %v235_v26 = vadd.f32 %v234_v17, %v233_v13  ;;  %v247_v27 = vsel %vm225_vm9, %v220_v16, 0.0  ;;  %188 = vst [vmem:[#allocation3 + $0xc] sm:$0x3] %v180_v61  ;;  %v416_v48 = vld [vmem:[#allocation4 + $0xa] sm:$0x3] }
  0x2e   :  { %v331_v29 = vrot.slane %v330_v19, 1  ;;  %v344_v30 = vadd.f32 %v343_v20, %v342_v10  ;;  %v229_v31 = vrot.slane %v228_v21, 2  ;;  %v242_v32 = vadd.f32 %v241_v22, %v240_v18  ;;  %189 = vst [vmem:[#allocation3 + $0xe] sm:$0x3] %v181_v62  ;;  %v417_v57 = vld [vmem:[#allocation4 + $0xc] sm:$0x3] }
  0x2f   :  { %v338_v33 = vrot.slane %v337_v23, 1  ;;  %v351_v34 = vadd.f32 %v350_v25, %v349_v15  ;;  %v236_v35 = vrot.slane %v235_v26, 2  ;;  %v248_v0 = vrot.slane %v247_v27, 4  ;;  %162 = vst [vmem:[#allocation2 + $0x8] sm:$0x3] %v154_v52 }
  0x30   :  { %v332_v37 = vadd.f32 %v331_v29, %v330_v19  ;;  %v345_v38 = vrot.slane %v344_v30, 1  ;;  %v230_v39 = vadd.f32 %v229_v31, %v228_v21  ;;  %v243_v40 = vrot.slane %v242_v32, 2  ;;  %163 = vst [vmem:[#allocation2 + $0xa] sm:$0x3] %v155_v58  ;;  %v418_v59 = vld [vmem:[#allocation4 + $0xe] sm:$0x3] }
  0x31   :  { %v339_v41 = vadd.f32 %v338_v33, %v337_v23  ;;  %v352_v42 = vrot.slane %v351_v34, 1  ;;  %v237_v43 = vadd.f32 %v236_v35, %v235_v26  ;;  %v249_v44 = vadd.f32 %v248_v0, %v247_v27  ;;  %164 = vst [vmem:[#allocation2 + $0xc] sm:$0x3] %v156_v3  ;;  %v322_v3 = vld [vmem:[#allocation3 + $0x8] sm:$0x3] }
  0x32   :  { %v346_v24 = vadd.f32 %v345_v38, %v344_v30  ;;  %v231_v45 = vrot.slane %v230_v39, 1  ;;  %v244_v46 = vadd.f32 %v243_v40, %v242_v32  ;;  %v447_v49 = vsel %vm225_vm9, %v415_v36, 0.0  ;;  %165 = vst [vmem:[#allocation2 + $0xe] sm:$0x3] %v157_v8 }
  0x33   :  { %v353_v28 = vadd.f32 %v352_v42, %v351_v34  ;;  %v390_v50 = vsel %vm290_vm13, %v339_v41, %v332_v37  ;;  %v238_v51 = vrot.slane %v237_v43, 1  ;;  %v250_v53 = vrot.slane %v249_v44, 2  ;;  %v323_v4 = vld [vmem:[#allocation3 + $0xa] sm:$0x3] }
  0x34   :  { %v391_v52 = vsel %vm292_vm14, %v346_v24, %v390_v50  ;;  %v232_v54 = vadd.f32 %v231_v45, %v230_v39  ;;  %v245_v56 = vrot.slane %v244_v46, 1  ;;  %v448_v58 = vrot.slane %v447_v49, 4  ;;  %v324_v13 = vld [vmem:[#allocation3 + $0xc] sm:$0x3] }
  0x35   :  { %v392_v60 = vsel %vm294_vm15, %v353_v28, %v391_v52  ;;  %v239_v47 = vadd.f32 %v238_v51, %v237_v43  ;;  %v251_v61 = vadd.f32 %v250_v53, %v249_v44  ;;  %v454_v62 = vsel %vm225_vm9, %v416_v48, 0.0  ;;  %v325_v25 = vld [vmem:[#allocation3 + $0xe] sm:$0x3] }
  0x36   :  { %v398_v63 = vsel %vm301_vm0, %v392_v60, 0.0  ;;  %v246_v1 = vadd.f32 %v245_v56, %v244_v46  ;;  %v449_v2 = vadd.f32 %v448_v58, %v447_v49  ;;  %v455_v55 = vrot.slane %v454_v62, 4  ;;  %v221_v36 = vld [vmem:[#allocation2 + $0x8] sm:$0x3] }
  0x37   :  { %399 = vadd.xlane.f32.xlu1 %v398_v63  ;;  %v252_v5 = vrot.slane %v251_v61, 1  ;;  %v291_v6 = vsel %vm290_vm13, %v239_v47, %v232_v54  ;;  %v461_v7 = vsel %vm225_vm9, %v417_v57, 0.0  ;;  %v468_v8 = vsel %vm225_vm9, %v418_v59, 0.0  ;;  %v222_v53 = vld [vmem:[#allocation2 + $0xa] sm:$0x3] }
  0x38   :  { %v293_v9 = vsel %vm292_vm14, %v246_v1, %v291_v6  ;;  %v450_v10 = vrot.slane %v449_v2, 2  ;;  %v456_v11 = vadd.f32 %v455_v55, %v454_v62  ;;  %v462_v12 = vrot.slane %v461_v7, 4  ;;  %v223_v63 = vld [vmem:[#allocation2 + $0xc] sm:$0x3] }
  0x39   :  { %v253_v14 = vadd.f32 %v252_v5, %v251_v61  ;;  %v469_v15 = vrot.slane %v468_v8, 4  ;;  %v354_v16 = vsel %vm225_vm9, %v322_v3, 0.0  ;;  %v361_v17 = vsel %vm225_vm9, %v323_v4, 0.0  ;;  %v224_v1 = vld [vmem:[#allocation2 + $0xe] sm:$0x3] }
  0x3a   :  { %v451_v18 = vadd.f32 %v450_v10, %v449_v2  ;;  %v457_v19 = vrot.slane %v456_v11, 2  ;;  %v463_v20 = vadd.f32 %v462_v12, %v461_v7  ;;  %v355_v21 = vrot.slane %v354_v16, 4 }
  0x3b   :  { %v295_v22 = vsel %vm294_vm15, %v253_v14, %v293_v9  ;;  %v470_v23 = vadd.f32 %v469_v15, %v468_v8  ;;  %v362_v26 = vrot.slane %v361_v17, 4  ;;  %v368_v27 = vsel %vm225_vm9, %v324_v13, 0.0 }
  0x3c   :  { %v302_v29 = vsel %vm301_vm0, %v295_v22, 0.0  ;;  %v452_v30 = vrot.slane %v451_v18, 1  ;;  %v458_v31 = vadd.f32 %v457_v19, %v456_v11  ;;  %v464_v32 = vrot.slane %v463_v20, 2 }
  0x3d   :  { %303 = vadd.xlane.f32.xlu0 %v302_v29  ;;  %v471_v33 = vrot.slane %v470_v23, 2  ;;  %v356_v34 = vadd.f32 %v355_v21, %v354_v16  ;;  %v363_v35 = vadd.f32 %v362_v26, %v361_v17  ;;  %v369_v0 = vrot.slane %v368_v27, 4 }
  0x3e   :  { %v453_v37 = vadd.f32 %v452_v30, %v451_v18  ;;  %v459_v38 = vrot.slane %v458_v31, 1  ;;  %v465_v39 = vadd.f32 %v464_v32, %v463_v20  ;;  %v375_v40 = vsel %vm225_vm9, %v325_v25, 0.0 }
  0x3f   :  { %v472_v41 = vadd.f32 %v471_v33, %v470_v23  ;;  %v357_v42 = vrot.slane %v356_v34, 2  ;;  %v364_v43 = vrot.slane %v363_v35, 2  ;;  %v370_v44 = vadd.f32 %v369_v0, %v368_v27 }
  0x40   :  { %v460_v24 = vadd.f32 %v459_v38, %v458_v31  ;;  %v466_v45 = vrot.slane %v465_v39, 1  ;;  %v376_v46 = vrot.slane %v375_v40, 4  ;;  %v254_v48 = vsel %vm225_vm9, %v221_v36, 0.0 }
  0x41   :  { %v473_v49 = vrot.slane %v472_v41, 1  ;;  %v358_v28 = vadd.f32 %v357_v42, %v356_v34  ;;  %v365_v50 = vadd.f32 %v364_v43, %v363_v35  ;;  %v371_v51 = vrot.slane %v370_v44, 2 }
  0x42   :  { %v467_v52 = vadd.f32 %v466_v45, %v465_v39  ;;  %v486_v54 = vsel %vm290_vm13, %v460_v24, %v453_v37  ;;  %v377_v56 = vadd.f32 %v376_v46, %v375_v40  ;;  %v255_v57 = vrot.slane %v254_v48, 4 }
  0x43   :  { %v474_v59 = vadd.f32 %v473_v49, %v472_v41  ;;  %v359_v58 = vrot.slane %v358_v28, 1  ;;  %v366_v60 = vrot.slane %v365_v50, 1  ;;  %v372_v47 = vadd.f32 %v371_v51, %v370_v44 }
  0x44   :  { %v487_v61 = vsel %vm292_vm14, %v467_v52, %v486_v54  ;;  %v378_v62 = vrot.slane %v377_v56, 2  ;;  %v256_v2 = vadd.f32 %v255_v57, %v254_v48  ;;  %v261_v55 = vsel %vm225_vm9, %v222_v53, 0.0 }
  0x45   :  { %v488_v3 = vsel %vm294_vm15, %v474_v59, %v487_v61  ;;  %v360_v4 = vadd.f32 %v359_v58, %v358_v28  ;;  %v367_v5 = vadd.f32 %v366_v60, %v365_v50  ;;  %v373_v6 = vrot.slane %v372_v47, 1 }
  0x46   :  { %v494_v7 = vsel %vm301_vm0, %v488_v3, 0.0  ;;  %v379_v8 = vadd.f32 %v378_v62, %v377_v56  ;;  %v257_v9 = vrot.slane %v256_v2, 2  ;;  %v262_v10 = vrot.slane %v261_v55, 4 }
  0x47   :  { %495 = vadd.xlane.f32.xlu2 %v494_v7  ;;  %v374_v11 = vadd.f32 %v373_v6, %v372_v47  ;;  %v393_v12 = vsel %vm290_vm13, %v367_v5, %v360_v4  ;;  %v268_v13 = vsel %vm225_vm9, %v223_v63, 0.0  ;;  %v275_v14 = vsel %vm225_vm9, %v224_v1, 0.0 }
  0x48   :  { %v380_v15 = vrot.slane %v379_v8, 1  ;;  %v258_v16 = vadd.f32 %v257_v9, %v256_v2  ;;  %v263_v17 = vadd.f32 %v262_v10, %v261_v55  ;;  %v269_v18 = vrot.slane %v268_v13, 4 }
  0x49   :  { %v394_v19 = vsel %vm292_vm14, %v374_v11, %v393_v12  ;;  %v276_v20 = vrot.slane %v275_v14, 4  ;;  %v310_v45 = vlaneseq }
  0x4a   :  { %v381_v21 = vadd.f32 %v380_v15, %v379_v8  ;;  %v259_v22 = vrot.slane %v258_v16, 1  ;;  %v264_v23 = vrot.slane %v263_v17, 2  ;;  %v270_v25 = vadd.f32 %v269_v18, %v268_v13 }
  0x4b   :  { %v277_v26 = vadd.f32 %v276_v20, %v275_v14  ;;  %v311_v46 = vand.u32 127, %v310_v45 }
  0x4c   :  { %v395_v27 = vsel %vm294_vm15, %v381_v21, %v394_v19  ;;  %v265_v29 = vadd.f32 %v264_v23, %v263_v17  ;;  %v271_v30 = vrot.slane %v270_v25, 2  ;;  %v260_v33 = vadd.f32 %v259_v22, %v258_v16 }
  0x4d   :  { %v401_v31 = vsel %vm301_vm0, %v395_v27, 0.0  ;;  %v278_v32 = vrot.slane %v277_v26, 2 }
  0x4e   :  { %402 = vadd.xlane.f32.xlu1 %v401_v31  ;;  %v266_v34 = vrot.slane %v265_v29, 1  ;;  %v272_v35 = vadd.f32 %v271_v30, %v270_v25 }
  0x4f   :  { %v279_v0 = vadd.f32 %v278_v32, %v277_v26 }
  0x50   :  { %v267_v36 = vadd.f32 %v266_v34, %v265_v29  ;;  %v273_v37 = vrot.slane %v272_v35, 1 }
  0x51   :  { %v280_v38 = vrot.slane %v279_v0, 1 }
  0x52   :  { %v274_v39 = vadd.f32 %v273_v37, %v272_v35  ;;  %v296_v40 = vsel %vm290_vm13, %v267_v36, %v260_v33 }
  0x53   :  { %v281_v41 = vadd.f32 %v280_v38, %v279_v0 }
  0x54   :  { %v297_v42 = vsel %vm292_vm14, %v274_v39, %v296_v40 }
  0x55   :  { %v298_v43 = vsel %vm294_vm15, %v281_v41, %v297_v42 }
  0x56   :  { %v305_v44 = vsel %vm301_vm0, %v298_v43, 0.0 }
  0x57   :  { %306 = vadd.xlane.f32.xlu0 %v305_v44 }
  0x98   :  { %v493_v24 = vpop.xlane.xlu2 %492 }
  0x99   :  { %v499_v28 = vperm.slane %v493_v24, %v311_v46 }
  0xaa   :  { %v400_v48 = vpop.xlane.xlu1 %399 }
  0xab   :  { %v406_v54 = vperm.slane %v400_v48, %v311_v46 }
  0xb0   :  { %v304_v53 = vpop.xlane.xlu0 %303 }
  0xb1   :  { %v312_v58 = vperm.slane %v304_v53, %v311_v46 }
  0xba   :  { %v496_v49 = vpop.xlane.xlu2 %495 }
  0xbb   :  { %v500_v50 = vperm.slane %v496_v49, %v311_v46 }
  0xbd   :  { %v501_v51 = vsel %vm290_vm13, %v500_v50, %v499_v28 }
  0xbe   :  { %503 = vst.msk [vmem:[%s748_s4] sm:$0x3] %vm316_vm5, %v501_v51 }
  0xc1   :  { %v403_v52 = vpop.xlane.xlu1 %402 }
  0xc2   :  { %v407_v56 = vperm.slane %v403_v52, %v311_v46 }
  0xc4   :  { %v408_v57 = vsel %vm290_vm13, %v407_v56, %v406_v54 }
  0xc5   :  { %410 = vst.msk [vmem:[%s749_s3] sm:$0x3] %vm316_vm5, %v408_v57 }
  0xca   :  { %v307_v59 = vpop.xlane.xlu0 %306 }
  0xcb   :  { %v313_v60 = vperm.slane %v307_v59, %v311_v46 }
  0xcd   :  { %v314_v47 = vsel %vm290_vm13, %v313_v60, %v312_v58 }
  0xce   :  { %317 = vst.msk [vmem:[%s750_s2] sm:$0x3] %vm316_vm5, %v314_v47 }

</bundles_post_ra>
